<compile_context>
chip_gen: v5e
topology: v5e:2x2
jax: 0.10.0
libtpu: 0.0.40
codegen_flags: <defaults>
</compile_context>

<pallas_src>
import functools

import jax
import jax.numpy as jnp
from jax.experimental import pallas as pl
from jax.experimental.pallas import tpu as pltpu

LANE = 128


def _round_up(x, m):
    return (x + m - 1) // m * m


def _mlp_kernel(x_ref,
                w1_ref, b1_ref,
                w2_ref, b2_ref,
                w3_ref, b3_ref,
                w4_ref, b4_ref,
                w5_ref, b5_ref,
                o_ref, *, compute_dtype):
    """Fused forward: 4x (Linear+ReLU) + Linear.

    Weights/biases are fully VMEM-resident (padded to lane-aligned widths); only
    the batch dimension is tiled by the grid.  Matmul operands are cast to
    `compute_dtype` (bf16 on v6e/v7x); accumulation, bias add and ReLU stay f32.
    """

    def layer(h, w_ref, b_ref, relu):
        y = jnp.dot(h.astype(compute_dtype), w_ref[...].astype(compute_dtype),
                    preferred_element_type=jnp.float32)
        y = y + b_ref[...]
        if relu:
            y = jnp.maximum(y, 0.0)
        return y

    h = x_ref[...]
    h = layer(h, w1_ref, b1_ref, True)
    h = layer(h, w2_ref, b2_ref, True)
    h = layer(h, w3_ref, b3_ref, True)
    h = layer(h, w4_ref, b4_ref, True)
    h = layer(h, w5_ref, b5_ref, False)
    o_ref[...] = h.astype(o_ref.dtype)


def init_params(key, n_feature, n_hidden, n_output):
    """torch.nn.Linear-style U(-1/sqrt(fan_in), 1/sqrt(fan_in)) init, stored (in, out)."""
    dims = [n_feature, n_hidden, 100, 50, 25, n_output]
    params = []
    for i in range(len(dims) - 1):
        fan_in, fan_out = dims[i], dims[i + 1]
        key, kw, kb = jax.random.split(key, 3)
        bound = 1.0 / jnp.sqrt(jnp.float32(fan_in))
        w = jax.random.uniform(kw, (fan_in, fan_out), jnp.float32, -bound, bound)
        b = jax.random.uniform(kb, (1, fan_out), jnp.float32, -bound, bound)
        params.append((w, b))
    return params


def pad_params(params):
    """Zero-pad every layer's output dim (and matching next-layer input dim) to 128.

    Exact: padded activation columns are 0 (zero W cols + zero bias, ReLU(0)=0) and
    padded W rows are 0, so they never contribute to downstream sums.
    """
    padded = []
    prev_out_p = None
    for idx, (w, b) in enumerate(params):
        fan_in, fan_out = w.shape
        in_p = fan_in if idx == 0 else prev_out_p      # input feature dim kept native
        out_p = _round_up(fan_out, LANE)
        w_p = jnp.zeros((in_p, out_p), w.dtype).at[:fan_in, :fan_out].set(w)
        b_p = jnp.zeros((1, out_p), b.dtype).at[:, :fan_out].set(b)
        padded.append((w_p, b_p))
        prev_out_p = out_p
    return padded


def mlp_forward(x, padded_params, n_output, *, batch_tile=512, use_bf16=True):
    """x: (B, n_feature) f32.  padded_params: output of pad_params().  Returns (B, n_output)."""
    B, F = x.shape
    compute_dtype = jnp.bfloat16 if use_bf16 else jnp.float32

    # Batch tile: multiple of 16 (bf16 sublane packing), never larger than needed.
    bt = min(_round_up(max(batch_tile, 16), 16), _round_up(B, 16))
    Bp = _round_up(B, bt)
    if Bp != B:
        x = jnp.pad(x, ((0, Bp - B), (0, 0)))

    out_p = padded_params[-1][0].shape[1]

    flat = []
    for w, b in padded_params:
        flat.extend([w, b])

    # x / out tiled over the batch; weights & biases are full-array resident blocks.
    in_specs = [pl.BlockSpec((bt, F), lambda i: (i, 0))]
    in_specs += [pl.BlockSpec(a.shape, lambda i: (0, 0)) for a in flat]
    out_spec = pl.BlockSpec((bt, out_p), lambda i: (i, 0))

    flops = 2 * Bp * sum(w.shape[0] * w.shape[1] for w, _ in padded_params)
    bytes_accessed = (Bp * F * 4
                      + sum(int(a.size) * 4 for a in flat)
                      + Bp * out_p * 4)
    cost = pl.CostEstimate(flops=flops, transcendentals=0,
                           bytes_accessed=bytes_accessed)

    out = pl.pallas_call(
        functools.partial(_mlp_kernel, compute_dtype=compute_dtype),
        out_shape=jax.ShapeDtypeStruct((Bp, out_p), jnp.float32),
        grid_spec=pltpu.PrefetchScalarGridSpec(
            num_scalar_prefetch=0,
            grid=(Bp // bt,),
            in_specs=in_specs,
            out_specs=out_spec,
        ),
        compiler_params=pltpu.CompilerParams(
            dimension_semantics=("parallel",)),
        cost_estimate=cost,
    )(x, *flat)

    return out[:B, :n_output]


def mlp_reference(x, params, compute_dtype=jnp.float32):
    h = x
    for i, (w, b) in enumerate(params):
        y = jnp.dot(h.astype(compute_dtype), w.astype(compute_dtype),
                    preferred_element_type=jnp.float32) + b
        h = jnp.maximum(y, 0.0) if i < len(params) - 1 else y
    return h


if __name__ == "__main__":
    n_feature, n_hidden, n_output = 32, 64, 8
    batch = 32  # small test shapes; batch_tile=16 below gives a 2-step parallel grid

    key = jax.random.PRNGKey(0)
    key, kx = jax.random.split(key)
    x = jax.random.normal(kx, (batch, n_feature), jnp.float32)

    params = init_params(key, n_feature, n_hidden, n_output)
    padded = pad_params(params)

    out = mlp_forward(x, padded, n_output, batch_tile=16, use_bf16=True)
    out = jax.block_until_ready(out)
    assert out.shape == (batch, n_output)

    # Match against a reference that uses the same bf16 matmul-operand casting.
    ref_matched = mlp_reference(x, params, compute_dtype=jnp.bfloat16)
    assert jnp.allclose(out, ref_matched, atol=1e-2, rtol=1e-2), \
        "mismatch vs bf16-matched reference"

    # Sanity check against the full-f32 reference with a bf16-appropriate tolerance.
    ref_f32 = mlp_reference(x, params)
    assert jnp.allclose(out, ref_f32, atol=1e-1, rtol=1e-1), \
        "mismatch vs f32 reference"

    print("KERNEL_OK")
</pallas_src>

<mosaic_0001>
module attributes {stable_mosaic.version = 11 : i64} {
  func.func @_mlp_kernel(%arg0: i32, %arg1: memref<16x32xf32, #tpu.memory_space<vmem>>, %arg2: memref<32x128xf32, #tpu.memory_space<vmem>>, %arg3: memref<1x128xf32, #tpu.memory_space<vmem>>, %arg4: memref<128x128xf32, #tpu.memory_space<vmem>>, %arg5: memref<1x128xf32, #tpu.memory_space<vmem>>, %arg6: memref<128x128xf32, #tpu.memory_space<vmem>>, %arg7: memref<1x128xf32, #tpu.memory_space<vmem>>, %arg8: memref<128x128xf32, #tpu.memory_space<vmem>>, %arg9: memref<1x128xf32, #tpu.memory_space<vmem>>, %arg10: memref<128x128xf32, #tpu.memory_space<vmem>>, %arg11: memref<1x128xf32, #tpu.memory_space<vmem>>, %arg12: memref<16x128xf32, #tpu.memory_space<vmem>>) attributes {dimension_semantics = [#tpu.dimension_semantics<parallel>], iteration_bounds = array<i64: 2>, scalar_prefetch = 0 : i64, scratch_operands = 0 : i64, tpu.core_type = #tpu.core_type<tc>, window_params = [{transform_indices = @transform_0, window_bounds = array<i64: 16, 32>}, {pipeline_mode = #tpu.pipeline_mode<synchronous>, transform_indices = @transform_1, window_bounds = array<i64: 32, 128>}, {pipeline_mode = #tpu.pipeline_mode<synchronous>, transform_indices = @transform_2, window_bounds = array<i64: 1, 128>}, {pipeline_mode = #tpu.pipeline_mode<synchronous>, transform_indices = @transform_3, window_bounds = array<i64: 128, 128>}, {pipeline_mode = #tpu.pipeline_mode<synchronous>, transform_indices = @transform_4, window_bounds = array<i64: 1, 128>}, {pipeline_mode = #tpu.pipeline_mode<synchronous>, transform_indices = @transform_5, window_bounds = array<i64: 128, 128>}, {pipeline_mode = #tpu.pipeline_mode<synchronous>, transform_indices = @transform_6, window_bounds = array<i64: 1, 128>}, {pipeline_mode = #tpu.pipeline_mode<synchronous>, transform_indices = @transform_7, window_bounds = array<i64: 128, 128>}, {pipeline_mode = #tpu.pipeline_mode<synchronous>, transform_indices = @transform_8, window_bounds = array<i64: 1, 128>}, {pipeline_mode = #tpu.pipeline_mode<synchronous>, transform_indices = @transform_9, window_bounds = array<i64: 128, 128>}, {pipeline_mode = #tpu.pipeline_mode<synchronous>, transform_indices = @transform_10, window_bounds = array<i64: 1, 128>}, {transform_indices = @transform_11, window_bounds = array<i64: 16, 128>}]} {
    %c0 = arith.constant 0 : index
    %c0_0 = arith.constant 0 : index
    %0 = vector.load %arg1[%c0, %c0_0] : memref<16x32xf32, #tpu.memory_space<vmem>>, vector<16x32xf32>
    %1 = arith.truncf %0 : vector<16x32xf32> to vector<16x32xbf16>
    %c0_1 = arith.constant 0 : index
    %c0_2 = arith.constant 0 : index
    %2 = vector.load %arg2[%c0_1, %c0_2] : memref<32x128xf32, #tpu.memory_space<vmem>>, vector<32x128xf32>
    %3 = arith.truncf %2 : vector<32x128xf32> to vector<32x128xbf16>
    %cst = arith.constant dense<0.000000e+00> : vector<16x128xf32>
    %4 = tpu.matmul %1, %3, %cst {dimension_numbers = #tpu.dot_dimension_numbers<[1], [0], [0], [1], [0, 0, 1, 1], [], []>} : vector<16x32xbf16>, vector<32x128xbf16>, vector<16x128xf32> -> vector<16x128xf32>
    %c0_3 = arith.constant 0 : index
    %c0_4 = arith.constant 0 : index
    %5 = vector.load %arg3[%c0_3, %c0_4] : memref<1x128xf32, #tpu.memory_space<vmem>>, vector<1x128xf32>
    %6 = vector.broadcast %5 : vector<1x128xf32> to vector<16x128xf32>
    %7 = arith.addf %4, %6 : vector<16x128xf32>
    %cst_5 = arith.constant 0.000000e+00 : f32
    %8 = vector.broadcast %cst_5 : f32 to vector<16x128xf32>
    %9 = arith.maximumf %7, %8 : vector<16x128xf32>
    %10 = arith.truncf %9 : vector<16x128xf32> to vector<16x128xbf16>
    %c0_6 = arith.constant 0 : index
    %c0_7 = arith.constant 0 : index
    %11 = vector.load %arg4[%c0_6, %c0_7] : memref<128x128xf32, #tpu.memory_space<vmem>>, vector<128x128xf32>
    %12 = arith.truncf %11 : vector<128x128xf32> to vector<128x128xbf16>
    %cst_8 = arith.constant dense<0.000000e+00> : vector<16x128xf32>
    %13 = tpu.matmul %10, %12, %cst_8 {dimension_numbers = #tpu.dot_dimension_numbers<[1], [0], [0], [1], [0, 0, 1, 1], [], []>} : vector<16x128xbf16>, vector<128x128xbf16>, vector<16x128xf32> -> vector<16x128xf32>
    %c0_9 = arith.constant 0 : index
    %c0_10 = arith.constant 0 : index
    %14 = vector.load %arg5[%c0_9, %c0_10] : memref<1x128xf32, #tpu.memory_space<vmem>>, vector<1x128xf32>
    %15 = vector.broadcast %14 : vector<1x128xf32> to vector<16x128xf32>
    %16 = arith.addf %13, %15 : vector<16x128xf32>
    %cst_11 = arith.constant 0.000000e+00 : f32
    %17 = vector.broadcast %cst_11 : f32 to vector<16x128xf32>
    %18 = arith.maximumf %16, %17 : vector<16x128xf32>
    %19 = arith.truncf %18 : vector<16x128xf32> to vector<16x128xbf16>
    %c0_12 = arith.constant 0 : index
    %c0_13 = arith.constant 0 : index
    %20 = vector.load %arg6[%c0_12, %c0_13] : memref<128x128xf32, #tpu.memory_space<vmem>>, vector<128x128xf32>
    %21 = arith.truncf %20 : vector<128x128xf32> to vector<128x128xbf16>
    %cst_14 = arith.constant dense<0.000000e+00> : vector<16x128xf32>
    %22 = tpu.matmul %19, %21, %cst_14 {dimension_numbers = #tpu.dot_dimension_numbers<[1], [0], [0], [1], [0, 0, 1, 1], [], []>} : vector<16x128xbf16>, vector<128x128xbf16>, vector<16x128xf32> -> vector<16x128xf32>
    %c0_15 = arith.constant 0 : index
    %c0_16 = arith.constant 0 : index
    %23 = vector.load %arg7[%c0_15, %c0_16] : memref<1x128xf32, #tpu.memory_space<vmem>>, vector<1x128xf32>
    %24 = vector.broadcast %23 : vector<1x128xf32> to vector<16x128xf32>
    %25 = arith.addf %22, %24 : vector<16x128xf32>
    %cst_17 = arith.constant 0.000000e+00 : f32
    %26 = vector.broadcast %cst_17 : f32 to vector<16x128xf32>
    %27 = arith.maximumf %25, %26 : vector<16x128xf32>
    %28 = arith.truncf %27 : vector<16x128xf32> to vector<16x128xbf16>
    %c0_18 = arith.constant 0 : index
    %c0_19 = arith.constant 0 : index
    %29 = vector.load %arg8[%c0_18, %c0_19] : memref<128x128xf32, #tpu.memory_space<vmem>>, vector<128x128xf32>
    %30 = arith.truncf %29 : vector<128x128xf32> to vector<128x128xbf16>
    %cst_20 = arith.constant dense<0.000000e+00> : vector<16x128xf32>
    %31 = tpu.matmul %28, %30, %cst_20 {dimension_numbers = #tpu.dot_dimension_numbers<[1], [0], [0], [1], [0, 0, 1, 1], [], []>} : vector<16x128xbf16>, vector<128x128xbf16>, vector<16x128xf32> -> vector<16x128xf32>
    %c0_21 = arith.constant 0 : index
    %c0_22 = arith.constant 0 : index
    %32 = vector.load %arg9[%c0_21, %c0_22] : memref<1x128xf32, #tpu.memory_space<vmem>>, vector<1x128xf32>
    %33 = vector.broadcast %32 : vector<1x128xf32> to vector<16x128xf32>
    %34 = arith.addf %31, %33 : vector<16x128xf32>
    %cst_23 = arith.constant 0.000000e+00 : f32
    %35 = vector.broadcast %cst_23 : f32 to vector<16x128xf32>
    %36 = arith.maximumf %34, %35 : vector<16x128xf32>
    %37 = arith.truncf %36 : vector<16x128xf32> to vector<16x128xbf16>
    %c0_24 = arith.constant 0 : index
    %c0_25 = arith.constant 0 : index
    %38 = vector.load %arg10[%c0_24, %c0_25] : memref<128x128xf32, #tpu.memory_space<vmem>>, vector<128x128xf32>
    %39 = arith.truncf %38 : vector<128x128xf32> to vector<128x128xbf16>
    %cst_26 = arith.constant dense<0.000000e+00> : vector<16x128xf32>
    %40 = tpu.matmul %37, %39, %cst_26 {dimension_numbers = #tpu.dot_dimension_numbers<[1], [0], [0], [1], [0, 0, 1, 1], [], []>} : vector<16x128xbf16>, vector<128x128xbf16>, vector<16x128xf32> -> vector<16x128xf32>
    %c0_27 = arith.constant 0 : index
    %c0_28 = arith.constant 0 : index
    %41 = vector.load %arg11[%c0_27, %c0_28] : memref<1x128xf32, #tpu.memory_space<vmem>>, vector<1x128xf32>
    %42 = vector.broadcast %41 : vector<1x128xf32> to vector<16x128xf32>
    %43 = arith.addf %40, %42 : vector<16x128xf32>
    %c0_29 = arith.constant 0 : index
    %c0_30 = arith.constant 0 : index
    %44 = vector.load %arg12[%c0_29, %c0_30] : memref<16x128xf32, #tpu.memory_space<vmem>>, vector<16x128xf32>
    tpu.vector_store %arg12[%c0_29, %c0_30], %43 {strides = array<i32>} : memref<16x128xf32, #tpu.memory_space<vmem>>, vector<16x128xf32>,
    return
  }
  func.func @transform_0(%arg0: i32) -> (i32, i32) {
    %c0_i32 = arith.constant 0 : i32
    %c0_i32_0 = arith.constant 0 : i32
    return %arg0, %c0_i32 : i32, i32
  }
  func.func @transform_1(%arg0: i32) -> (i32, i32) {
    %c0_i32 = arith.constant 0 : i32
    %c0_i32_0 = arith.constant 0 : i32
    %c0_i32_1 = arith.constant 0 : i32
    return %c0_i32, %c0_i32_0 : i32, i32
  }
  func.func @transform_2(%arg0: i32) -> (i32, i32) {
    %c0_i32 = arith.constant 0 : i32
    %c0_i32_0 = arith.constant 0 : i32
    %c0_i32_1 = arith.constant 0 : i32
    return %c0_i32, %c0_i32_0 : i32, i32
  }
  func.func @transform_3(%arg0: i32) -> (i32, i32) {
    %c0_i32 = arith.constant 0 : i32
    %c0_i32_0 = arith.constant 0 : i32
    %c0_i32_1 = arith.constant 0 : i32
    return %c0_i32, %c0_i32_0 : i32, i32
  }
  func.func @transform_4(%arg0: i32) -> (i32, i32) {
    %c0_i32 = arith.constant 0 : i32
    %c0_i32_0 = arith.constant 0 : i32
    %c0_i32_1 = arith.constant 0 : i32
    return %c0_i32, %c0_i32_0 : i32, i32
  }
  func.func @transform_5(%arg0: i32) -> (i32, i32) {
    %c0_i32 = arith.constant 0 : i32
    %c0_i32_0 = arith.constant 0 : i32
    %c0_i32_1 = arith.constant 0 : i32
    return %c0_i32, %c0_i32_0 : i32, i32
  }
  func.func @transform_6(%arg0: i32) -> (i32, i32) {
    %c0_i32 = arith.constant 0 : i32
    %c0_i32_0 = arith.constant 0 : i32
    %c0_i32_1 = arith.constant 0 : i32
    return %c0_i32, %c0_i32_0 : i32, i32
  }
  func.func @transform_7(%arg0: i32) -> (i32, i32) {
    %c0_i32 = arith.constant 0 : i32
    %c0_i32_0 = arith.constant 0 : i32
    %c0_i32_1 = arith.constant 0 : i32
    return %c0_i32, %c0_i32_0 : i32, i32
  }
  func.func @transform_8(%arg0: i32) -> (i32, i32) {
    %c0_i32 = arith.constant 0 : i32
    %c0_i32_0 = arith.constant 0 : i32
    %c0_i32_1 = arith.constant 0 : i32
    return %c0_i32, %c0_i32_0 : i32, i32
  }
  func.func @transform_9(%arg0: i32) -> (i32, i32) {
    %c0_i32 = arith.constant 0 : i32
    %c0_i32_0 = arith.constant 0 : i32
    %c0_i32_1 = arith.constant 0 : i32
    return %c0_i32, %c0_i32_0 : i32, i32
  }
  func.func @transform_10(%arg0: i32) -> (i32, i32) {
    %c0_i32 = arith.constant 0 : i32
    %c0_i32_0 = arith.constant 0 : i32
    %c0_i32_1 = arith.constant 0 : i32
    return %c0_i32, %c0_i32_0 : i32, i32
  }
  func.func @transform_11(%arg0: i32) -> (i32, i32) {
    %c0_i32 = arith.constant 0 : i32
    %c0_i32_0 = arith.constant 0 : i32
    return %arg0, %c0_i32 : i32, i32
  }
}

</mosaic_0001>

<bundles_post_ra>
// kernel: tpu_custom_call.1
= control target key start
LH: loop header
LB: loop body
LE: loop exit
PB: predicated region body
PF: predicated region fallthrough
CT: control target
= control target key end

     0   :  { %s1512_s0 = inlined_call_operand.hbm [shape: f32[32,32], index: 0, kind: input, shape index: {}]   ;;  %s1513_s1 = inlined_call_operand.hbm [shape: f32[32,128], index: 1, kind: input, shape index: {}]   ;;  %s1514_s2 = inlined_call_operand.vmem [shape: f32[1,128], index: 2, kind: input, shape index: {}]   ;;  %s1515_s3 = inlined_call_operand.hbm [shape: f32[128,128], index: 3, kind: input, shape index: {}]   ;;  %s1516_s4 = inlined_call_operand.vmem [shape: f32[1,128], index: 4, kind: input, shape index: {}]   ;;  %s1517_s5 = inlined_call_operand.hbm [shape: f32[128,128], index: 5, kind: input, shape index: {}]   ;;  %s1518_s6 = inlined_call_operand.vmem [shape: f32[1,128], index: 6, kind: input, shape index: {}]   ;;  %s1519_s7 = inlined_call_operand.hbm [shape: f32[128,128], index: 7, kind: input, shape index: {}]   ;;  %s1520_s8 = inlined_call_operand.vmem [shape: f32[1,128], index: 8, kind: input, shape index: {}]   ;;  %s1521_s9 = inlined_call_operand.hbm [shape: f32[128,128], index: 9, kind: input, shape index: {}]   ;;  %s1522_s10 = inlined_call_operand.vmem [shape: f32[1,128], index: 10, kind: input, shape index: {}]   ;;  %s1523_s11 = inlined_call_operand.hbm [shape: f32[32,128], index: 11, kind: output, shape index: {}]  }
   0x1   :  { %1526 = sst [smem:[#allocation19_spill]] %s1513_s1 }
   0x2   :  { %1527 = sst [smem:[#allocation20_spill]] %s1515_s3 }
   0x3   :  { %1528 = sst [smem:[#allocation21_spill]] %s1517_s5 }
   0x4   :  { %1529 = sst [smem:[#allocation22_spill]] %s1519_s7 }
   0x5   :  { %1530 = sst [smem:[#allocation23_spill]] %s1521_s9 }
   0x6   :  { %16 = vsyncpa [#allocation3], 0 }
   0x7   :  { %18 = vsyncpa [#allocation3 + $0x1], 0 }
   0x8   :  { %19 = vsyncpa [#allocation6], 0 }
   0x9   :  { %20 = vsyncpa [#allocation9], 0 }
   0xa   :  { %21 = vsyncpa [#allocation12], 0 }
   0xb   :  { %22 = vsyncpa [#allocation4], 0 }
   0xc   :  { %24 = vsyncpa [#allocation4 + $0x1], 0  ;;  %s1305_s17 = smov 0   ;;  %s1307_s18 = smov 0  }
   0xd   :  { %s1309_s19 = smov 0   ;;  %s1311_s20 = smov 0  }
   0xe LB: > { %s1531_s1 = sld [smem:[#allocation19_spill]]  ;;  %s1329_s24 = sadd.s32 4294967295, %s1234_s20   ;;  %s1234_s20 = sphi %s1311_s20, %s1548_s20   ;;  %s1230_s19 = sphi %s1309_s19, %s1547_s19   ;;  %s1226_s18 = sphi %s1307_s18, %s1546_s18   ;;  %s1222_s17 = sphi %s1305_s17, %s1545_s17  }
   0xf   : > { %p844_p0 = scmp.ge.s32.totalorder %s1234_s20, 1  ;;  %p51_p1 = scmp.eq.s32.totalorder %s1329_s24, 0 }
  0x10   : > { %p297_p2 = scmp.lt.s32.totalorder %s1234_s20, 3  ;;  %s1236_s26 = smov [#allocation5]  }
  0x11   : > { %s310_s27 = sshll.u32 %s1236_s26, 4  ;;  %s1533_s5 = sld [smem:[#allocation21_spill]]  ;;  %s311_s27 = int_to_ptr.vmem [resolvable:$true] %s310_s27 }
  0x12   : > { %p1334_p3 = pnand %p844_p0, %p297_p2  ;;  %s1535_s3 = sld [smem:[#allocation20_spill]] }
  0x13   : > { %s1237_s16 = smov [#allocation8]   ;;  %s1524_s22 = smov 128  }
  0x14   : > { %s308_s23 = sshll.u32 %s1531_s1, 4  ;;  %p894_p4 = pneg %p1334_p3  ;;  %s309_s23 = int_to_ptr.hbm [resolvable:$true] %s308_s23 }
  0x15   : > { %s344_s21 = sshll.u32 %s1237_s16, 4  ;;  %s1525_s26 = smov 8   ;;  %s345_s21 = int_to_ptr.vmem [resolvable:$true] %s344_s21 }
  0x16   : > { %p1346_p6 = pnand %p894_p4, %p51_p1  ;;  %s1536_s7 = sld [smem:[#allocation22_spill]] }
  0x17   : > { %s342_s30 = sshll.u32 %s1533_s5, 4  ;;  %s1240_s14 = smov [#allocation7]   ;;  %s343_s30 = int_to_ptr.hbm [resolvable:$true] %s342_s30 }
  0x18   : > { %s325_s15 = sshll.u32 %s1535_s3, 4  ;;  %s327_s16 = sshll.u32 %s1240_s14, 4  ;;  %s326_s15 = int_to_ptr.hbm [resolvable:$true] %s325_s15  ;;  %s328_s16 = int_to_ptr.vmem [resolvable:$true] %s327_s16 }
  0x19   : > { %897 = dma.hbm_to_vmem [thread:$0]  (!%p1346_p6), %s309_s23, 512, %s311_s27, [#allocation6], %s1524_s22, %s1524_s22, %s1525_s26  }
  0x1a   : > { %903 = dma.hbm_to_vmem [thread:$0]  (!%p1346_p6), %s343_s30, 2048, %s345_s21, [#allocation9], %s1524_s22, %s1524_s22, %s1525_s26  }
  0x1b   : > { %900 = dma.hbm_to_vmem [thread:$0]  (!%p1346_p6), %s326_s15, 2048, %s328_s16, [#allocation6], %s1524_s22, %s1524_s22, %s1525_s26  }
  0x1c   : > { %s359_s13 = sshll.u32 %s1536_s7, 4  ;;  %s1241_s23 = smov [#allocation10]   ;;  %s360_s13 = int_to_ptr.hbm [resolvable:$true] %s359_s13 }
  0x1d   : > { %s361_s27 = sshll.u32 %s1241_s23, 4  ;;  %s1537_s9 = sld [smem:[#allocation23_spill]]  ;;  %s362_s27 = int_to_ptr.vmem [resolvable:$true] %s361_s27 }
  0x1e   : > { %906 = dma.hbm_to_vmem [thread:$0]  (!%p1346_p6), %s360_s13, 2048, %s362_s27, [#allocation9], %s1524_s22, %s1524_s22, %s1525_s26  }
  0x1f   : > { %s1242_s15 = smov [#allocation11]   ;;  %s843_s14 = sadd.s32 4294967294, %s1234_s20  }
  0x20   : > { %s378_s29 = sshll.u32 %s1242_s15, 4  ;;  %s1386_s16 = sadd.s32 1, %s1234_s20   ;;  %s379_s29 = int_to_ptr.vmem [resolvable:$true] %s378_s29 }
  0x21   : > { %s37_s23 = sadd.s32 1, %s1230_s19  ;;  %s34_s30 = ssub.s32 %s1234_s20, %s1386_s16 }
  0x22   : > { %p44_p7 = scmp.ne.s32.totalorder %s1230_s19, %s1226_s18  ;;  %p35_p8 = scmp.eq.s32.totalorder %s34_s30, 0 }
  0x23   : > { %s376_s28 = sshll.u32 %s1537_s9, 4  ;;  %p45_p9 = scmp.eq.s32.totalorder %s1234_s20, 0  ;;  %s377_s28 = int_to_ptr.hbm [resolvable:$true] %s376_s28 }
  0x24   : > { %909 = dma.hbm_to_vmem [thread:$0]  (!%p1346_p6), %s377_s28, 2048, %s379_s29, [#allocation12], %s1524_s22, %s1524_s22, %s1525_s26  }
  0x25   : > { %p50_p10 = scmp.ne.s32.totalorder %s1226_s18, %s1222_s17  ;;  %p284_p11 = scmp.eq.s32.totalorder %s1329_s24, 1 }
  0x26   : > { %s1398_s13 = scalar_select %p35_p8, %s1230_s19, %s37_s23  }
  0x27   : > { %p1402_p12 = por %p51_p1, %p50_p10  ;;  %p1406_p13 = por %p284_p11, %p44_p7 }
  0x28   : > { %p290_p0 = scmp.eq.s32.totalorder %s843_s14, 1  ;;  %p46_p2 = por %p45_p9, %p44_p7 }
  0x29   : > { %s395_s21 = sand.u32 1, %s1230_s19   ;;  %p923_p6 = scmp.lt.s32.totalorder %s1234_s20, 2 }
  0x2a   : > { %p1411_p4 = por %p290_p0, %p50_p10  ;;  %s851_s15 = sshll.u32 %s395_s21, 4 }
  0x2b   : > { %s868_s29 = sshll.u32 %s1234_s20, 4  ;;  %s399_s1 = scalar_lea.vmem [#allocation2], %s851_s15 }
  0x2c   : > { %s404_s22 = scalar_lea.hbm %s1512_s0, %s868_s29  ;;  %s407_s3 = sshll.u32 %s399_s1, 4  ;;  %s408_s3 = int_to_ptr.vmem [resolvable:$true] %s407_s3 }
  0x2d   : > { %s405_s26 = sshll.u32 %s404_s22, 4  ;;  %p1420_p8 = pnand %p923_p6, %p46_p2  ;;  %s406_s26 = int_to_ptr.hbm [resolvable:$true] %s405_s26 }
  0x2e   : > { %s396_s5 = scalar_lea.sflag [#allocation3], %s395_s21  ;;  %s1126_s7 = sshra.s32 %s406_s26, 4  ;;  %s1127_s7 = int_to_ptr.hbm [resolvable:$true] %s1126_s7 }
  0x2f   : > { %s1128_s9 = scalar_lea.hbm %s1127_s7, 16  ;;  %p1130_p9 = pneg %p1420_p8 }
  0x30   : > { %p1129_p7 = scmp.ne.s32.totalorder %s1127_s7, %s1128_s9  ;;  %s1133_s1 = scalar_lea.hbm %s1512_s0, 32 }
  0x31   : > { %p1134_p0 = scmp.lt.s32.totalorder %s1127_s7, %s1512_s0  ;;  %p1135_p2 = scmp.lt.s32.totalorder %s1133_s1, %s1128_s9 }
  0x32   : > { %p1131_p10 = pnand %p1130_p9, %p1129_p7 }
  0x33   : > { %p1136_p6 = por %p1135_p2, %p1134_p0 }
  0x34   : > { %p1132_p11 = pneg %p1131_p10 }
  0x36   : > { %p1137_p5 = pnand %p1136_p6, %p1132_p11 }
  0x38   : > { %1140 = shalt.err (!%p1137_p5)
}
  0x39   : > { %s1542_s21 = smov 8   ;;  %s1543_s30 = smov 128  }
  0x3a   : > { %913 = dma.hbm_to_vmem [thread:$0]  (!%p1420_p8), %s406_s26, 256, %s408_s3, %s396_s5, %s1543_s30, %s1543_s30, %s1542_s21  }
  0x3b   : > { %419 = sbr.rel (%p1334_p3) target bundleno = 793 (0x319), region = 64  ;;  %s1440_s29 = sand.u32 (!%p1334_p3), 1, %s1226_s18  }
  0x3c   : > { %s855_s7 = sshll.u32 (!%p1334_p3), %s1440_s29, 4  ;;  %s422_s9 = scalar_lea.sflag (!%p1334_p3), [#allocation3], %s1440_s29 }
  0x3d   : > { %s425_s22 = scalar_lea.vmem (!%p1334_p3), [#allocation2], %s855_s7 }
  0x40   : > { %1201 = dma.done.wait (%p1402_p12), %s422_s9, 256  }
  0x41   : > { %1203 = vsyncadd (%p1402_p12), %s422_s9, 4294967040 }
  0x42   : > { %1205 = dma.done.wait (%p51_p1), [#allocation6], 2560  }
  0x43   : > { %1207 = vsyncadd (%p51_p1), [#allocation6], 4294964736 }
  0x44   : > { %1209 = dma.done.wait (%p51_p1), [#allocation9], 4096  }
  0x45   : > { %1211 = vsyncadd (%p51_p1), [#allocation9], 4294963200 }
  0x46   : > { %1213 = dma.done.wait (%p51_p1), [#allocation12], 2048  }
  0x47   : > { %1215 = vsyncadd (%p51_p1), [#allocation12], 4294965248  ;;  %v498_v0 = vld [vmem:[#allocation5 + $0x10] sm:$0xff]  ;;  %v499_v1 = vld [vmem:[#allocation5 + $0x18] sm:$0xff]  ;;  %vm506_vm0 = vcmask 261120   ;;  %s869_s30 = sshll.u32 %s1329_s24, 4 }
  0x48   : > { %v496_v2 = vld [vmem:[#allocation5] sm:$0xff]  ;;  %v501_v3 = vpack.c.bf16 %v499_v1, %v498_v0  ;;  %v497_v4 = vld [vmem:[#allocation5 + $0x8] sm:$0xff]  ;;  %v541_v5 = vld [vmem:[#allocation7 + $0x70] sm:$0xff]  ;;  %s718_s3 = scalar_lea.hbm %s1523_s11, %s869_s30  ;;  %s489_s5 = scalar_lea.vmem [#allocation13], %s855_s7 }
  0x49   : > { %v542_v6 = vld [vmem:[#allocation7 + $0x78] sm:$0xff]  ;;  %v539_v7 = vld [vmem:[#allocation7 + $0x60] sm:$0xff]  ;;  %v500_v8 = vpack.c.bf16 %v497_v4, %v496_v2  ;;  %v540_v12 = vld [vmem:[#allocation7 + $0x68] sm:$0xff]  ;;  %s719_s25 = sshll.u32 %s489_s5, 4  ;;  %s721_s26 = sshll.u32 %s718_s3, 4  ;;  %s720_s25 = int_to_ptr.vmem [resolvable:$true] %s719_s25  ;;  %s722_s26 = int_to_ptr.hbm [resolvable:$true] %s721_s26 }
  0x4a   : > { %516 = vmatpush.bf16.msra.mxu0 %v501_v3  ;;  %v493_v9 = vld [vmem:[%s425_s22] sm:$0xff]  ;;  %v494_v10 = vld [vmem:[%s425_s22 + $0x8] sm:$0xff]  ;;  %v550_v11 = vpack.c.bf16 %v542_v6, %v541_v5  ;;  %v549_v13 = vpack.c.bf16 %v540_v12, %v539_v7  ;;  %s707_s12 = scalar_lea.sflag [#allocation4], %s1440_s29  ;;  %s1170_s14 = sshra.s32 %s722_s26, 4  ;;  %s1171_s14 = int_to_ptr.hbm [resolvable:$true] %s1170_s14 }
  0x4b   : > { %v537_v14 = vld [vmem:[#allocation7 + $0x50] sm:$0xff]  ;;  %v495_v15 = vpack.c.bf16 %v494_v10, %v493_v9  ;;  %v538_v16 = vld [vmem:[#allocation7 + $0x58] sm:$0xff]  ;;  %v535_v18 = vld [vmem:[#allocation7 + $0x40] sm:$0xff]  ;;  %s1172_s24 = scalar_lea.hbm %s1171_s14, 16  ;;  %s1176_s7 = scalar_lea.hbm %s1523_s11, 32 }
  0x4c   : > { %555 = vmatpush.bf16.msra.mxu1 %v550_v11  ;;  %v548_v17 = vpack.c.bf16 %v538_v16, %v537_v14  ;;  %v536_v19 = vld [vmem:[#allocation7 + $0x48] sm:$0xff]  ;;  %v533_v21 = vld [vmem:[#allocation7 + $0x30] sm:$0xff]  ;;  %v534_v22 = vld [vmem:[#allocation7 + $0x38] sm:$0xff]  ;;  %p1173_p1 = scmp.ne.s32.totalorder %s1171_s14, %s1172_s24  ;;  %p1177_p12 = scmp.lt.s32.totalorder %s1171_s14, %s1523_s11 }
  0x4d   : > { %v547_v20 = vpack.c.bf16 %v536_v19, %v535_v18  ;;  %v546_v23 = vpack.c.bf16 %v534_v22, %v533_v21  ;;  %v531_v24 = vld [vmem:[#allocation7 + $0x20] sm:$0xff]  ;;  %v532_v25 = vld [vmem:[#allocation7 + $0x28] sm:$0xff]  ;;  %v529_v27 = vld [vmem:[#allocation7 + $0x10] sm:$0xff]  ;;  %p1178_p8 = scmp.lt.s32.totalorder %s1176_s7, %s1172_s24 }
  0x4e   : > { %517 = vmatpush.bf16.msra.mxu0 %v500_v8  ;;  %v545_v26 = vpack.c.bf16 %v532_v25, %v531_v24  ;;  %v530_v28 = vld [vmem:[#allocation7 + $0x18] sm:$0xff]  ;;  %v527_v30 = vld [vmem:[#allocation7] sm:$0xff]  ;;  %v528_v31 = vld [vmem:[#allocation7 + $0x8] sm:$0xff]  ;;  %p1174_p3 = pnand %p1173_p1, %p1406_p13 }
  0x4f   : > { %v544_v29 = vpack.c.bf16 %v530_v28, %v529_v27  ;;  %v543_v32 = vpack.c.bf16 %v528_v31, %v527_v30  ;;  %v586_v33 = vld [vmem:[#allocation8 + $0x70] sm:$0xff]  ;;  %v587_v34 = vld [vmem:[#allocation8 + $0x78] sm:$0xff]  ;;  %v584_v35 = vld [vmem:[#allocation8 + $0x60] sm:$0xff]  ;;  %p1179_p7 = por %p1178_p8, %p1177_p12 }
  0x50   : > { %556 = vmatpush.bf16.msra.mxu1 %v549_v13  ;;  %v595_v36 = vpack.c.bf16 %v587_v34, %v586_v33  ;;  %v585_v37 = vld [vmem:[#allocation8 + $0x68] sm:$0xff]  ;;  %v582_v39 = vld [vmem:[#allocation8 + $0x50] sm:$0xff]  ;;  %v583_v40 = vld [vmem:[#allocation8 + $0x58] sm:$0xff]  ;;  %p1175_p5 = pneg %p1174_p3 }
  0x51   : > { %862 = vmatmul.msk.bf16.vlgmr.msra.gmra.mxu0 %vm506_vm0, %v495_v15  ;;  %v594_v38 = vpack.c.bf16 %v585_v37, %v584_v35  ;;  %v593_v41 = vpack.c.bf16 %v583_v40, %v582_v39  ;;  %v580_v42 = vld [vmem:[#allocation8 + $0x40] sm:$0xff]  ;;  %v581_v43 = vld [vmem:[#allocation8 + $0x48] sm:$0xff]  ;;  %v578_v53 = vld [vmem:[#allocation8 + $0x30] sm:$0xff] }
  0x52   : > { %600 = vmatpush.bf16.msra.mxu2 %v595_v36  ;;  %v592_v44 = vpack.c.bf16 %v581_v43, %v580_v42  ;;  %v971_v46 = vld [vmem:[%s1514_s2] ss:$0 sm:$0xff]  ;;  %v579_v54 = vld [vmem:[#allocation8 + $0x38] sm:$0xff]  ;;  %v577_v57 = vld [vmem:[#allocation8 + $0x28] sm:$0xff]  ;;  %p1180_p9 = pnand %p1179_p7, %p1175_p5 }
  0x53   : > { %v591_v55 = vpack.c.bf16 %v579_v54, %v578_v53  ;;  %v576_v56 = vld [vmem:[#allocation8 + $0x20] sm:$0xff]  ;;  %v574_v59 = vld [vmem:[#allocation8 + $0x10] sm:$0xff]  ;;  %v575_v60 = vld [vmem:[#allocation8 + $0x18] sm:$0xff] }
  0x54   : > { %557 = vmatpush.bf16.msra.mxu1 %v548_v17  ;;  %v590_v58 = vpack.c.bf16 %v577_v57, %v576_v56  ;;  %v589_v61 = vpack.c.bf16 %v575_v60, %v574_v59  ;;  %v572_v62 = vld [vmem:[#allocation8] sm:$0xff]  ;;  %v573_v63 = vld [vmem:[#allocation8 + $0x8] sm:$0xff]  ;;  %v631_v1 = vld [vmem:[#allocation10 + $0x70] sm:$0xff] }
  0x55   : > { %v588_v0 = vpack.c.bf16 %v573_v63, %v572_v62  ;;  %v632_v2 = vld [vmem:[#allocation10 + $0x78] sm:$0xff]  ;;  %v629_v3 = vld [vmem:[#allocation10 + $0x60] sm:$0xff]  ;;  %v630_v5 = vld [vmem:[#allocation10 + $0x68] sm:$0xff] }
  0x56   : > { %601 = vmatpush.bf16.msra.mxu2 %v594_v38  ;;  %v640_v4 = vpack.c.bf16 %v632_v2, %v631_v1  ;;  %v639_v6 = vpack.c.bf16 %v630_v5, %v629_v3  ;;  %v627_v7 = vld [vmem:[#allocation10 + $0x50] sm:$0xff]  ;;  %v628_v8 = vld [vmem:[#allocation10 + $0x58] sm:$0xff]  ;;  %v625_v10 = vld [vmem:[#allocation10 + $0x40] sm:$0xff] }
  0x57   : > { %v638_v9 = vpack.c.bf16 %v628_v8, %v627_v7  ;;  %v626_v11 = vld [vmem:[#allocation10 + $0x48] sm:$0xff]  ;;  %v972_v14 = vld [vmem:[%s1516_s4] ss:$0 sm:$0xff]  ;;  %v623_v21 = vld [vmem:[#allocation10 + $0x30] sm:$0xff] }
  0x58   : > { %558 = vmatpush.bf16.msra.mxu1 %v547_v20  ;;  %645 = vmatpush.bf16.msra.mxu3 %v640_v4  ;;  %v637_v12 = vpack.c.bf16 %v626_v11, %v625_v10  ;;  %v624_v22 = vld [vmem:[#allocation10 + $0x38] sm:$0xff]  ;;  %v621_v24 = vld [vmem:[#allocation10 + $0x20] sm:$0xff]  ;;  %v622_v25 = vld [vmem:[#allocation10 + $0x28] sm:$0xff] }
  0x59   : > { %v619_v27 = vld [vmem:[#allocation10 + $0x10] sm:$0xff]  ;;  %v620_v28 = vld [vmem:[#allocation10 + $0x18] sm:$0xff]  ;;  %v617_v30 = vld [vmem:[#allocation10] sm:$0xff] }
  0x5a   : > { %602 = vmatpush.bf16.msra.mxu2 %v593_v41  ;;  %v618_v31 = vld [vmem:[#allocation10 + $0x8] sm:$0xff]  ;;  %v676_v33 = vld [vmem:[#allocation11 + $0x70] sm:$0xff]  ;;  %v677_v34 = vld [vmem:[#allocation11 + $0x78] sm:$0xff] }
  0x5b   : > { %v674_v35 = vld [vmem:[#allocation11 + $0x60] sm:$0xff]  ;;  %v685_v36 = vpack.c.bf16 %v677_v34, %v676_v33  ;;  %v675_v37 = vld [vmem:[#allocation11 + $0x68] sm:$0xff]  ;;  %v672_v39 = vld [vmem:[#allocation11 + $0x50] sm:$0xff] }
  0x5c   : > { %559 = vmatpush.bf16.msra.mxu1 %v546_v23  ;;  %646 = vmatpush.bf16.msra.mxu3 %v639_v6  ;;  %v636_v23 = vpack.c.bf16 %v624_v22, %v623_v21  ;;  %v684_v38 = vpack.c.bf16 %v675_v37, %v674_v35  ;;  %v673_v40 = vld [vmem:[#allocation11 + $0x58] sm:$0xff]  ;;  %v670_v42 = vld [vmem:[#allocation11 + $0x40] sm:$0xff]  ;;  %v671_v43 = vld [vmem:[#allocation11 + $0x48] sm:$0xff] }
  0x5d   : > { %690 = vmatpush.bf16.msrb.mxu0 %v685_v36  ;;  %v683_v41 = vpack.c.bf16 %v673_v40, %v672_v39  ;;  %v668_v53 = vld [vmem:[#allocation11 + $0x30] sm:$0xff]  ;;  %v669_v54 = vld [vmem:[#allocation11 + $0x38] sm:$0xff]  ;;  %v666_v56 = vld [vmem:[#allocation11 + $0x20] sm:$0xff] }
  0x5e   : > { %603 = vmatpush.bf16.msra.mxu2 %v592_v44  ;;  %v682_v44 = vpack.c.bf16 %v671_v43, %v670_v42  ;;  %v667_v57 = vld [vmem:[#allocation11 + $0x28] sm:$0xff]  ;;  %v664_v59 = vld [vmem:[#allocation11 + $0x10] sm:$0xff]  ;;  %v665_v60 = vld [vmem:[#allocation11 + $0x18] sm:$0xff] }
  0x5f   : > { %v662_v62 = vld [vmem:[#allocation11] sm:$0xff]  ;;  %v663_v63 = vld [vmem:[#allocation11 + $0x8] sm:$0xff] }
  0x60   : > { %560 = vmatpush.bf16.msra.mxu1 %v545_v26  ;;  %647 = vmatpush.bf16.msra.mxu3 %v638_v9  ;;  %v635_v26 = vpack.c.bf16 %v622_v25, %v621_v24  ;;  %v974_v2 = vld [vmem:[%s1520_s8] ss:$0 sm:$0xff] }
  0x61   : > { %691 = vmatpush.bf16.msrb.mxu0 %v684_v38  ;;  %v975_v9 = vld [vmem:[%s1522_s10] ss:$0 sm:$0xff] }
  0x62   : > { %604 = vmatpush.bf16.msra.mxu2 %v591_v55  ;;  %v681_v55 = vpack.c.bf16 %v669_v54, %v668_v53 }
  0x64   : > { %561 = vmatpush.bf16.msra.mxu1 %v544_v29  ;;  %648 = vmatpush.bf16.msra.mxu3 %v637_v12  ;;  %v634_v29 = vpack.c.bf16 %v620_v28, %v619_v27 }
  0x65   : > { %692 = vmatpush.bf16.msrb.mxu0 %v683_v41 }
  0x66   : > { %605 = vmatpush.bf16.msra.mxu2 %v590_v58  ;;  %v680_v58 = vpack.c.bf16 %v667_v57, %v666_v56 }
  0x68   : > { %562 = vmatpush.bf16.msra.mxu1 %v543_v32  ;;  %649 = vmatpush.bf16.msra.mxu3 %v636_v23  ;;  %v633_v32 = vpack.c.bf16 %v618_v31, %v617_v30 }
  0x69   : > { %693 = vmatpush.bf16.msrb.mxu0 %v682_v44 }
  0x6a   : > { %606 = vmatpush.bf16.msra.mxu2 %v589_v61  ;;  %v679_v61 = vpack.c.bf16 %v665_v60, %v664_v59 }
  0x6c   : > { %650 = vmatpush.bf16.msra.mxu3 %v635_v26 }
  0x6d   : > { %694 = vmatpush.bf16.msrb.mxu0 %v681_v55 }
  0x6e   : > { %607 = vmatpush.bf16.msra.mxu2 %v588_v0  ;;  %v678_v0 = vpack.c.bf16 %v663_v63, %v662_v62 }
  0x70   : > { %651 = vmatpush.bf16.msra.mxu3 %v634_v29 }
  0x71   : > { %695 = vmatpush.bf16.msrb.mxu0 %v680_v58 }
  0x74   : > { %652 = vmatpush.bf16.msra.mxu3 %v633_v32 }
  0x75   : > { %696 = vmatpush.bf16.msrb.mxu0 %v679_v61 }
  0x79   : > { %697 = vmatpush.bf16.msrb.mxu0 %v678_v0 }
  0xce   : > { %v519_v45 = vpop.f32.mrf.mxu0 }
  0xcf   : > { %v520_v47 = vadd.f32 %v971_v46, %v519_v45 }
  0xd1   : > { %v524_v50 = vmax.f32 %v520_v47, 0.0 }
  0xd6   : > { %v521_v48 = vpop.f32.mrf.mxu0 }
  0xd7   : > { %v522_v49 = vadd.f32 %v971_v46, %v521_v48  ;;  %v973_v46 = vld [vmem:[%s1518_s6] ss:$0 sm:$0xff] }
  0xd9   : > { %v525_v51 = vmax.f32 %v522_v49, 0.0 }
  0xdb   : > { %v526_v52 = vpack.c.bf16 %v525_v51, %v524_v50 }
  0xdd   : > { %563 = vmatmul.bf16.vlgmr.msra.gmra.mxu1 %v526_v52 }
 0x15a   : > { %v564_v13 = vpop.f32.mrf.mxu1 }
 0x15b   : > { %v565_v15 = vadd.f32 %v972_v14, %v564_v13 }
 0x15d   : > { %v569_v18 = vmax.f32 %v565_v15, 0.0 }
 0x162   : > { %v566_v16 = vpop.f32.mrf.mxu1 }
 0x163   : > { %v567_v17 = vadd.f32 %v972_v14, %v566_v16 }
 0x165   : > { %v570_v19 = vmax.f32 %v567_v17, 0.0 }
 0x167   : > { %v571_v20 = vpack.c.bf16 %v570_v19, %v569_v18 }
 0x169   : > { %608 = vmatmul.bf16.vlgmr.msra.gmra.mxu2 %v571_v20 }
 0x1ec   : > { %v609_v45 = vpop.f32.mrf.mxu2 }
 0x1ed   : > { %v610_v47 = vadd.f32 %v973_v46, %v609_v45 }
 0x1ef   : > { %v614_v50 = vmax.f32 %v610_v47, 0.0 }
 0x1f4   : > { %v611_v48 = vpop.f32.mrf.mxu2 }
 0x1f5   : > { %v612_v49 = vadd.f32 %v973_v46, %v611_v48 }
 0x1f7   : > { %v615_v51 = vmax.f32 %v612_v49, 0.0 }
 0x1f9   : > { %v616_v52 = vpack.c.bf16 %v615_v51, %v614_v50 }
 0x1fb   : > { %653 = vmatmul.bf16.vlgmr.msra.gmra.mxu3 %v616_v52 }
 0x27e   : > { %v654_v1 = vpop.f32.mrf.mxu3 }
 0x27f   : > { %v655_v3 = vadd.f32 %v974_v2, %v654_v1 }
 0x281   : > { %v659_v6 = vmax.f32 %v655_v3, 0.0 }
 0x286   : > { %v656_v4 = vpop.f32.mrf.mxu3 }
 0x287   : > { %v657_v5 = vadd.f32 %v974_v2, %v656_v4 }
 0x289   : > { %v660_v7 = vmax.f32 %v657_v5, 0.0 }
 0x28b   : > { %v661_v8 = vpack.c.bf16 %v660_v7, %v659_v6 }
 0x28d   : > { %698 = vmatmul.bf16.vlgmr.msrb.gmra.mxu0 %v661_v8 }
 0x30a   : > { %v699_v10 = vpop.f32.mrf.mxu0 }
 0x30b   : > { %v700_v11 = vadd.f32 %v975_v9, %v699_v10 }
 0x30d   : > { %704 = vst [vmem:[%s489_s5] sm:$0xff] %v700_v11 }
 0x312   : > { %v701_v12 = vpop.f32.mrf.mxu0 }
 0x313   : > { %v702_v13 = vadd.f32 %v975_v9, %v701_v12 }
 0x315   : > { %705 = vst [vmem:[%s489_s5 + $0x8] sm:$0xff] %v702_v13 }
 0x316   : > { %1183 = shalt.err (!%p1180_p9)
}
 0x317   : > { %s1243_s29 = smov 128   ;;  %s1244_s30 = smov 8  }
 0x318   : > { %892 = dma.vmem_to_hbm [thread:$0]  (%p1406_p13), %s720_s25, 256, %s722_s26, %s707_s12, %s1243_s29, %s1243_s29, %s1244_s30  }
 0x319 PF: > { %s736_s9 = sand.u32 1, %s1222_s17   ;;  %p1544_p10 = scmp.ge.s32.totalorder %s1234_s20, 2 }
 0x31a   : > { %s737_s22 = scalar_lea.sflag [#allocation4], %s736_s9 }
 0x31b   : > { %p915_p11 = pnand %p1544_p10, %p1411_p4 }
 0x31d   : > { %p916_p0 = pneg %p915_p11 }
 0x31f   : > { %1217 = dma.done.wait (%p916_p0), %s737_s22, 256  }
 0x320   : > { %1219 = vsyncadd (%p916_p0), %s737_s22, 4294967040  ;;  %p27_p2 = scmp.ge.s32.totalorder %s1386_s16, 4   ;;  %s1545_s17 = smov %s1226_s18 }
 0x321   : > { %s1546_s18 = smov %s1230_s19  ;;  %s1547_s19 = smov %s1398_s13 }
 0x322   : > { %s1548_s20 = smov %s1386_s16  ;;  %29 = sbr.rel (!%p27_p2) target bundleno = 14 (0xe), region = 129 }
 0x327   :  { %743 = vsyncpa [#allocation3], 1 }
 0x328   :  { %745 = vsyncpa [#allocation3 + $0x1], 1 }
 0x329   :  { %746 = vsyncpa [#allocation6], 1 }
 0x32a   :  { %747 = vsyncpa [#allocation9], 1 }
 0x32b   :  { %748 = vsyncpa [#allocation12], 1 }
 0x32c   :  { %749 = vsyncpa [#allocation4], 1 }
 0x32d   :  { %751 = vsyncpa [#allocation4 + $0x1], 1 }

</bundles_post_ra>
